<compile_context>
chip_gen: v6e
topology: v6e:2x2x1
jax: 0.10.0
libtpu: 0.0.40
codegen_flags: <defaults>
</compile_context>

<pallas_src>
import numpy as np

import jax
import jax.numpy as jnp
from jax import lax
from jax.experimental import pallas as pl
from jax.experimental.pallas import tpu as pltpu


# ----------------------------------------------------------------------------
# Small helpers
# ----------------------------------------------------------------------------
def _round_up(x, m):
    return (x + m - 1) // m * m


def _pick_cout_tile(cout_p, cg):
    """Largest convenient Cout tile that is lane-dense and never splits a group."""
    for ct in (256, 128):
        if cout_p > ct and cout_p % ct == 0 and ct % cg == 0:
            return ct
    return cout_p


def _pad_row(v, n):
    v = v.astype(jnp.float32).reshape(-1)
    return jnp.pad(v, (0, n - v.shape[0])).reshape(1, n)


def _group_membership(cout, cout_p, groups):
    """(groups, cout_p) 0/1 matrix; padded channels belong to no group."""
    cg = cout // groups
    ch_group = np.arange(cout) // cg
    m = (np.arange(groups)[:, None] == ch_group[None, :]).astype(np.float32)
    m = np.pad(m, ((0, 0), (0, cout_p - cout)))
    return jnp.asarray(m)


def _pad_flatten_image(x_nhwc, dtype):
    """Spatially pad by 1, flatten (H+2, W+2) -> rows, and append a few zero
    rows so every in-kernel shifted slice stays in bounds."""
    B, H, W, C = x_nhwc.shape
    xp = jnp.pad(x_nhwc, ((0, 0), (1, 1), (1, 1), (0, 0)))
    npf = (H + 2) * (W + 2)
    npf_pad = _round_up(npf + 2, 8)
    xf = xp.reshape(B, npf, C)
    xf = jnp.pad(xf, ((0, 0), (0, npf_pad - npf), (0, 0)))
    return xf.astype(dtype)


def _prep_conv_weight(w, cin_p, cout_p, eps=1e-5):
    """Weight standardization (hoisted out of the kernel, eps added per review),
    then (kh, kw, ci, co) tap-major layout, channel-padded, bf16 for the MXU."""
    cout, cin = w.shape[0], w.shape[1]
    mean = jnp.mean(w, axis=(1, 2, 3), keepdims=True)
    var = jnp.mean((w - mean) ** 2, axis=(1, 2, 3), keepdims=True)   # correction=0
    wn = (w - mean) / jnp.sqrt(var + eps)
    wn = jnp.transpose(wn, (2, 3, 1, 0)).reshape(9, cin, cout)       # t = kh*3 + kw
    wn = jnp.pad(wn, ((0, 0), (0, cin_p - cin), (0, cout_p - cout)))
    return wn.astype(jnp.bfloat16)


# ----------------------------------------------------------------------------
# Kernels
# ----------------------------------------------------------------------------
def _make_block_kernel(*, Np, Wp, W, tap_offsets, res_off, inv_count,
                       apply_ss, res_mode, gn_eps=1e-5):
    """Fused Block.forward (+ optional fused ResnetBlock residual):
       WS-conv3x3 (9 shifted matmuls) -> GroupNorm -> [scale/shift] -> SiLU
       [-> + residual (1x1 conv or identity)]."""

    def kernel(*refs):
        x_ref, w_ref, b_ref, gamma_ref, beta_ref, memb_ref = refs[:6]
        rest = list(refs[6:])
        if apply_ss:
            scale_ref, shift_ref = rest[0], rest[1]
            rest = rest[2:]
        if res_mode == "conv":
            xres_ref, wres_ref, bres_ref = rest[0], rest[1], rest[2]
            rest = rest[3:]
        elif res_mode == "identity":
            xres_ref = rest[0]
            rest = rest[1:]
        o_ref = rest[0]

        # --- 3x3 conv: 9 accumulated bf16 MXU matmuls over shifted slices of
        #     the flattened spatially-padded image (no im2col materialization).
        off0 = tap_offsets[0]
        acc = jnp.dot(x_ref[0, off0:off0 + Np, :], w_ref[0],
                      preferred_element_type=jnp.float32)
        for t in range(1, 9):
            off = tap_offsets[t]
            acc = acc + jnp.dot(x_ref[0, off:off + Np, :], w_ref[t],
                                preferred_element_type=jnp.float32)
        y = acc + b_ref[...]                                       # (Np, CT) f32

        # Rows with (flat_idx mod Wp) >= W are horizontal-padding junk columns:
        # zero them so GroupNorm statistics only see the H*W valid pixels.
        col = lax.broadcasted_iota(jnp.int32, (Np, 1), 0) % Wp
        y = y * (col < W).astype(jnp.float32)

        # --- GroupNorm: per-channel sums + tiny (G, CT) membership reduce
        #     (VPU/XLU only; no (C, C) mask matmul). Stats in f32, var >= 0.
        memb = memb_ref[...]                                       # (G, CT) 0/1
        s1 = jnp.sum(y, axis=0, keepdims=True)                     # (1, CT)
        s2 = jnp.sum(y * y, axis=0, keepdims=True)
        g1 = jnp.sum(memb * s1, axis=1, keepdims=True)             # (G, 1)
        g2 = jnp.sum(memb * s2, axis=1, keepdims=True)
        mean = jnp.sum(memb * g1, axis=0, keepdims=True) * inv_count   # (1, CT)
        ex2 = jnp.sum(memb * g2, axis=0, keepdims=True) * inv_count
        var = jnp.maximum(ex2 - mean * mean, 0.0)
        y = (y - mean) * lax.rsqrt(var + gn_eps)
        y = y * gamma_ref[...] + beta_ref[...]

        # --- time-embedding scale/shift (block1 only) ---
        if apply_ss:
            y = y * (scale_ref[0] + 1.0) + shift_ref[0]

        # --- SiLU ---
        y = y * jax.nn.sigmoid(y)

        # --- fused residual (block2 only) ---
        if res_mode == "conv":
            res = jnp.dot(xres_ref[0, res_off:res_off + Np, :], wres_ref[...],
                          preferred_element_type=jnp.float32) + bres_ref[...]
            y = y + res
        elif res_mode == "identity":
            y = y + xres_ref[0, res_off:res_off + Np, :].astype(jnp.float32)

        o_ref[0] = y.astype(o_ref.dtype)

    return kernel


def _time_mlp_kernel(t_ref, w_ref, b_ref, o_ref):
    """out = SiLU(time_emb) @ W + b (tiny)."""
    t = t_ref[...]
    t = t * jax.nn.sigmoid(t)
    o_ref[...] = (jnp.dot(t, w_ref[...], preferred_element_type=jnp.float32)
                  + b_ref[...]).astype(o_ref.dtype)


# ----------------------------------------------------------------------------
# pallas_call wrappers
# ----------------------------------------------------------------------------
def _block_call(xp, w9, bias, gamma, beta, memb, *, H, W, cg,
                scale=None, shift=None, res_mode="none",
                res_x=None, res_w=None, res_b=None, out_dtype=jnp.float32):
    B, NPF, Cin_p = xp.shape
    Cout_p = w9.shape[2]
    G = memb.shape[0]
    Wp = W + 2
    Np = H * Wp
    tap_offsets = tuple(kh * Wp + kw for kh in range(3) for kw in range(3))
    res_off = Wp + 1                       # x[h, w] lives at flat row n + Wp + 1
    apply_ss = scale is not None
    inv_count = 1.0 / float(H * W * cg)    # valid only for full-HW blocks

    CT = _pick_cout_tile(Cout_p, cg)
    NT = Cout_p // CT

    kernel = _make_block_kernel(Np=Np, Wp=Wp, W=W, tap_offsets=tap_offsets,
                                res_off=res_off, inv_count=inv_count,
                                apply_ss=apply_ss, res_mode=res_mode)

    in_specs = [
        pl.BlockSpec((1, NPF, Cin_p), lambda b, t: (b, 0, 0)),   # padded image
        pl.BlockSpec((9, Cin_p, CT), lambda b, t: (0, 0, t)),    # standardized weights
        pl.BlockSpec((1, CT), lambda b, t: (0, t)),              # conv bias
        pl.BlockSpec((1, CT), lambda b, t: (0, t)),              # gn gamma
        pl.BlockSpec((1, CT), lambda b, t: (0, t)),              # gn beta
        pl.BlockSpec((G, CT), lambda b, t: (0, t)),              # group membership
    ]
    args = [xp, w9, bias, gamma, beta, memb]
    if apply_ss:
        in_specs += [pl.BlockSpec((1, 1, CT), lambda b, t: (b, 0, t)),
                     pl.BlockSpec((1, 1, CT), lambda b, t: (b, 0, t))]
        args += [scale, shift]
    if res_mode == "conv":
        cin_res = res_x.shape[2]
        in_specs += [pl.BlockSpec((1, NPF, cin_res), lambda b, t: (b, 0, 0)),
                     pl.BlockSpec((cin_res, CT), lambda b, t: (0, t)),
                     pl.BlockSpec((1, CT), lambda b, t: (0, t))]
        args += [res_x, res_w, res_b]
    elif res_mode == "identity":
        in_specs += [pl.BlockSpec((1, NPF, CT), lambda b, t: (b, 0, t))]
        args += [res_x]

    # explicit VMEM budget: double-buffered blocks + f32 accumulator + slack
    blk_bytes = (NPF * Cin_p * xp.dtype.itemsize + 9 * Cin_p * CT * 2
                 + (5 + G) * CT * 4 + Np * CT * jnp.dtype(out_dtype).itemsize)
    if res_mode == "conv":
        blk_bytes += (NPF * res_x.shape[2] * res_x.dtype.itemsize
                      + res_x.shape[2] * CT * 2 + CT * 4)
    elif res_mode == "identity":
        blk_bytes += NPF * CT * res_x.dtype.itemsize
    vmem_limit = int(min(max(2 * blk_bytes + Np * CT * 4 + (4 << 20), 32 << 20),
                         110 << 20))

    return pl.pallas_call(
        kernel,
        out_shape=jax.ShapeDtypeStruct((B, Np, Cout_p), out_dtype),
        grid=(B, NT),
        in_specs=in_specs,
        out_specs=pl.BlockSpec((1, Np, CT), lambda b, t: (b, 0, t)),
        compiler_params=pltpu.CompilerParams(
            dimension_semantics=("parallel", "parallel"),
            vmem_limit_bytes=vmem_limit),
    )(*args)


def _time_mlp_call(temb, w, b):
    B = temb.shape[0]
    C2 = w.shape[1]
    return pl.pallas_call(
        _time_mlp_kernel,
        out_shape=jax.ShapeDtypeStruct((B, C2), jnp.float32),
    )(temb, w, b)


# ----------------------------------------------------------------------------
# Parameters & forward pass
# ----------------------------------------------------------------------------
def init_resnet_block_params(key, in_channels, out_channels, time_emb_dim, groups=8):
    ks = jax.random.split(key, 12)
    s = 0.1
    p = {
        "w1": s * jax.random.normal(ks[0], (out_channels, in_channels, 3, 3), jnp.float32),
        "b1": s * jax.random.normal(ks[1], (out_channels,), jnp.float32),
        "gamma1": 1.0 + s * jax.random.normal(ks[2], (out_channels,), jnp.float32),
        "beta1": s * jax.random.normal(ks[3], (out_channels,), jnp.float32),
        "w2": s * jax.random.normal(ks[4], (out_channels, out_channels, 3, 3), jnp.float32),
        "b2": s * jax.random.normal(ks[5], (out_channels,), jnp.float32),
        "gamma2": 1.0 + s * jax.random.normal(ks[6], (out_channels,), jnp.float32),
        "beta2": s * jax.random.normal(ks[7], (out_channels,), jnp.float32),
    }
    if time_emb_dim is not None:
        p["w_mlp"] = s * jax.random.normal(ks[8], (2 * out_channels, time_emb_dim), jnp.float32)
        p["b_mlp"] = s * jax.random.normal(ks[9], (2 * out_channels,), jnp.float32)
    if in_channels != out_channels:
        p["w_res"] = s * jax.random.normal(ks[10], (out_channels, in_channels, 1, 1), jnp.float32)
        p["b_res"] = s * jax.random.normal(ks[11], (out_channels,), jnp.float32)
    return p


def resnet_block_forward(params, x_nchw, time_emb=None, groups=8):
    B, Cin, H, W = x_nchw.shape
    Cout = params["w1"].shape[0]
    assert Cout % groups == 0
    cg = Cout // groups
    Cin_p = _round_up(Cin, 128)
    Cout_p = _round_up(Cout, 128)

    # NHWC, lane-dense channel padding, spatial pad + flatten (bf16 MXU operand).
    x_nhwc = jnp.transpose(x_nchw, (0, 2, 3, 1)).astype(jnp.float32)
    x_nhwc = jnp.pad(x_nhwc, ((0, 0), (0, 0), (0, 0), (0, Cin_p - Cin)))
    xp_flat = _pad_flatten_image(x_nhwc, jnp.bfloat16)            # (B, NPF, Cin_p)

    memb = _group_membership(Cout, Cout_p, groups)                # (G, Cout_p)

    # time-embedding MLP -> (scale, shift), padded to Cout_p
    if time_emb is not None and "w_mlp" in params:
        temb = _time_mlp_call(time_emb.astype(jnp.float32),
                              jnp.transpose(params["w_mlp"]),     # (T, 2*Cout)
                              params["b_mlp"].reshape(1, -1))
        pad_c = ((0, 0), (0, Cout_p - Cout))
        scale = jnp.pad(temb[:, :Cout], pad_c).reshape(B, 1, Cout_p)
        shift = jnp.pad(temb[:, Cout:], pad_c).reshape(B, 1, Cout_p)
    else:
        scale = shift = None

    # --- block 1: WS-conv3x3 -> GroupNorm -> (scale+1)/shift -> SiLU ---
    h1 = _block_call(
        xp_flat, _prep_conv_weight(params["w1"], Cin_p, Cout_p),
        _pad_row(params["b1"], Cout_p), _pad_row(params["gamma1"], Cout_p),
        _pad_row(params["beta1"], Cout_p), memb,
        H=H, W=W, cg=cg, scale=scale, shift=shift,
        res_mode="none", out_dtype=jnp.bfloat16)                  # (B, H*(W+2), Cout_p)

    # re-pad block1's output spatially for block2 (drop junk columns)
    h1_img = h1.reshape(B, H, W + 2, Cout_p)[:, :, :W, :]
    hp_flat = _pad_flatten_image(h1_img, jnp.bfloat16)

    # --- block 2: WS-conv3x3 -> GroupNorm -> SiLU, residual fused in-kernel ---
    if "w_res" in params:
        res_kwargs = dict(
            res_mode="conv", res_x=xp_flat,
            res_w=jnp.pad(params["w_res"].reshape(Cout, Cin).T,
                          ((0, Cin_p - Cin), (0, Cout_p - Cout))).astype(jnp.bfloat16),
            res_b=_pad_row(params["b_res"], Cout_p))
    else:
        res_kwargs = dict(res_mode="identity", res_x=xp_flat)     # nn.Identity: plain add

    h2 = _block_call(
        hp_flat, _prep_conv_weight(params["w2"], Cout_p, Cout_p),
        _pad_row(params["b2"], Cout_p), _pad_row(params["gamma2"], Cout_p),
        _pad_row(params["beta2"], Cout_p), memb,
        H=H, W=W, cg=cg, out_dtype=jnp.float32, **res_kwargs)

    out = h2.reshape(B, H, W + 2, Cout_p)[:, :, :W, :Cout]
    return jnp.transpose(out, (0, 3, 1, 2))                       # back to NCHW


# ----------------------------------------------------------------------------
if __name__ == "__main__":
    B, Cin, Cout, H, W, T, G = 2, 8, 16, 16, 16, 32, 8
    key = jax.random.PRNGKey(0)
    k_param, k_x, k_t = jax.random.split(key, 3)

    params = init_resnet_block_params(k_param, Cin, Cout, T, groups=G)
    x = jax.random.normal(k_x, (B, Cin, H, W), jnp.float32)
    time_emb = jax.random.normal(k_t, (B, T), jnp.float32)

    out = resnet_block_forward(params, x, time_emb, groups=G)
    out = jax.block_until_ready(out)
    assert out.shape == (B, Cout, H, W), out.shape
    assert bool(jnp.all(jnp.isfinite(out)))
    print("KERNEL_OK")
</pallas_src>

<mosaic_0001>
module attributes {stable_mosaic.version = 11 : i64} {
  func.func @_time_mlp_kernel(%arg0: memref<2x32xf32, #tpu.memory_space<vmem>>, %arg1: memref<32x32xf32, #tpu.memory_space<vmem>>, %arg2: memref<1x32xf32, #tpu.memory_space<vmem>>, %arg3: memref<2x32xf32, #tpu.memory_space<vmem>>) attributes {dimension_semantics = [], scalar_prefetch = 0 : i64, scratch_operands = 0 : i64, tpu.core_type = #tpu.core_type<tc>} {
    %c0 = arith.constant 0 : index
    %c0_0 = arith.constant 0 : index
    %0 = vector.load %arg0[%c0, %c0_0] : memref<2x32xf32, #tpu.memory_space<vmem>>, vector<2x32xf32>
    %1 = arith.negf %0 : vector<2x32xf32>
    %2 = math.exp %1 : vector<2x32xf32>
    %cst = arith.constant 1.000000e+00 : f32
    %3 = vector.broadcast %cst : f32 to vector<2x32xf32>
    %4 = arith.addf %3, %2 : vector<2x32xf32>
    %5 = arith.divf %3, %4 : vector<2x32xf32>
    %6 = arith.mulf %0, %5 : vector<2x32xf32>
    %c0_1 = arith.constant 0 : index
    %c0_2 = arith.constant 0 : index
    %7 = vector.load %arg1[%c0_1, %c0_2] : memref<32x32xf32, #tpu.memory_space<vmem>>, vector<32x32xf32>
    %cst_3 = arith.constant dense<0.000000e+00> : vector<2x32xf32>
    %8 = tpu.matmul %6, %7, %cst_3 {dimension_numbers = #tpu.dot_dimension_numbers<[1], [0], [0], [1], [0, 0, 1, 1], [], []>} : vector<2x32xf32>, vector<32x32xf32>, vector<2x32xf32> -> vector<2x32xf32>
    %c0_4 = arith.constant 0 : index
    %c0_5 = arith.constant 0 : index
    %9 = vector.load %arg2[%c0_4, %c0_5] : memref<1x32xf32, #tpu.memory_space<vmem>>, vector<1x32xf32>
    %10 = vector.broadcast %9 : vector<1x32xf32> to vector<2x32xf32>
    %11 = arith.addf %8, %10 : vector<2x32xf32>
    %c0_6 = arith.constant 0 : index
    %c0_7 = arith.constant 0 : index
    %12 = vector.load %arg3[%c0_6, %c0_7] : memref<2x32xf32, #tpu.memory_space<vmem>>, vector<2x32xf32>
    tpu.vector_store %arg3[%c0_6, %c0_7], %11 {strides = array<i32>} : memref<2x32xf32, #tpu.memory_space<vmem>>, vector<2x32xf32>,
    return
  }
}

</mosaic_0001>

<bundles_post_ra>
// kernel: tpu_custom_call.1
= control target key start
LH: loop header
LB: loop body
LE: loop exit
PB: predicated region body
PF: predicated region fallthrough
CT: control target
= control target key end

     0   :  { %8 = vsyncpa [#allocation3], 0  ;;  %s287_s0 = inlined_call_operand.hbm [shape: f32[2,32], index: 0, kind: input, shape index: {}]   ;;  %s288_s1 = inlined_call_operand.hbm [shape: f32[32,32], index: 1, kind: input, shape index: {}]   ;;  %s289_s2 = inlined_call_operand.vmem [shape: f32[1,32], index: 2, kind: input, shape index: {}]   ;;  %s290_s3 = inlined_call_operand.hbm [shape: f32[2,32], index: 3, kind: output, shape index: {}]  }
   0x1   :  { %9 = vsyncpa [#allocation6], 0 }
   0x2   :  { %10 = vsyncpa [#allocation4], 0  ;;  %s248_s12 = smov [#allocation2]   ;;  %s249_s14 = smov [#allocation5]  }
   0x3   :  { %s17_s13 = sshll.u32 %s248_s12, 4  ;;  %s26_s15 = sshll.u32 %s249_s14, 4  ;;  %s18_s13 = int_to_ptr.vmem [resolvable:$true] %s17_s13  ;;  %s27_s15 = int_to_ptr.vmem [resolvable:$true] %s26_s15 }
   0x4   :  { %s190_s16 = scalar_lea.vmem %s18_s13, 32  ;;  %p195_p1 = scmp.lt.s32.totalorder %s18_s13, %s18_s13 }
   0x5   :  { %p191_p0 = scmp.ne.s32.totalorder %s18_s13, %s190_s16  ;;  %p196_p2 = scmp.lt.s32.totalorder %s190_s16, %s190_s16 }
   0x7   :  { %p197_p3 = por %p196_p2, %p195_p1 }
   0x9   :  { %p198_p4 = pnand %p197_p3, %p191_p0 }
   0xb   :  { %201 = shalt.err (!%p198_p4)
}
   0xc   :  { %20 = dma.hbm_to_vmem [thread:$0]  %s287_s0, 32, %s18_s13, [#allocation3]  }
   0xd   :  { %s210_s19 = scalar_lea.vmem %s27_s15, 512  ;;  %p215_p6 = scmp.lt.s32.totalorder %s27_s15, %s27_s15 }
   0xe   :  { %p211_p5 = scmp.ne.s32.totalorder %s27_s15, %s210_s19  ;;  %p216_p7 = scmp.lt.s32.totalorder %s210_s19, %s210_s19 }
  0x10   :  { %p217_p8 = por %p216_p7, %p215_p6 }
  0x12   :  { %p218_p9 = pnand %p217_p8, %p211_p5 }
  0x14   :  { %221 = shalt.err (!%p218_p9)
}
  0x15   :  { %s250_s20 = smov 128   ;;  %s251_s21 = smov 8  }
  0x16   :  { %32 = dma.hbm_to_vmem [thread:$0]  %s288_s1, 512, %s27_s15, [#allocation6], %s250_s20, %s250_s20, %s251_s21  }
  0x17   :  { %242 = dma.done.wait [#allocation3], 32  }
  0x18   :  { %243 = vsyncadd [#allocation3], 4294967264 }
  0x19   :  { %244 = dma.done.wait [#allocation6], 512  }
  0x1a   :  { %245 = vsyncadd [#allocation6], 4294966784  ;;  %v252_v0 = vmov 0.0   ;;  %vm253_vm0 = vmmov 0   ;;  %v52_v1 = vld [vmem:[#allocation5 + $0x18] sm:$0xff]  ;;  %v51_v2 = vld [vmem:[#allocation5 + $0x10] sm:$0xff] }
  0x1b   :  { %160 = vmatprep.subr.mxu0 %v252_v0  ;;  %168 = vmatprep.mubr.msk.f32.mxu0 %vm253_vm0, %v252_v0  ;;  %v41_v3 = vld [vmem:[#allocation2] sm:$0x3]  ;;  %v50_v4 = vld [vmem:[#allocation5 + $0x8] sm:$0xff]  ;;  %v49_v6 = vld [vmem:[#allocation5] sm:$0xff]  ;;  %vm60_vm1 = vcmask 261120   ;;  %s254_s24 = smov [#allocation7]  }
  0x1c   :  { %161 = vmatpush3.msra.mxu0 %v52_v1  ;;  %v152_v5 = vmul.f32 -1.442695, %v41_v3  ;;  %v153_v11 = vld [vmem:[%s289_s2] ss:$0 sm:$0xff]  ;;  %s142_s25 = sshll.u32 %s254_s24, 4  ;;  %vm134_vm2 = vcmask 254976   ;;  %s143_s25 = int_to_ptr.vmem [resolvable:$true] %s142_s25 }
  0x1d   :  { %162 = vmatprep.subr.mxu0 %v252_v0  ;;  %s222_s26 = scalar_lea.vmem %s143_s25, 32  ;;  %p227_p11 = scmp.lt.s32.totalorder %s143_s25, %s143_s25 }
  0x1e   :  { %163 = vmatpush3.msra.mxu0 %v51_v2  ;;  %178 = vpow2.f32 %v152_v5  ;;  %p223_p10 = scmp.ne.s32.totalorder %s143_s25, %s222_s26  ;;  %p228_p12 = scmp.lt.s32.totalorder %s222_s26, %s222_s26 }
  0x1f   :  { %164 = vmatprep.subr.mxu0 %v252_v0 }
  0x20   :  { %165 = vmatpush3.msra.mxu0 %v50_v4  ;;  %p229_p13 = por %p228_p12, %p227_p11 }
  0x21   :  { %166 = vmatprep.subr.mxu0 %v252_v0 }
  0x22   :  { %167 = vmatpush3.msra.mxu0 %v49_v6  ;;  %p230_p0 = pnand %p229_p13, %p223_p10 }
  0x2b   :  { %v179_v7 = vpop.eup %178 }
  0x2c   :  { %v45_v8 = vadd.f32 1.0, %v179_v7 }
  0x2e   :  { %180 = vrcp.f32 %v45_v8 }
  0x3b   :  { %v181_v9 = vpop.eup %180 }
  0x3c   :  { %v48_v10 = vmul.f32 %v181_v9, %v41_v3 }
  0x3e   :  { %169 = vmatmul.mubr.msk.f32.vlgmr.msra.gmra.mxu0 %vm60_vm1, %v48_v10 }
  0xfe   :  { %v130_v12 = vpop.f32.mrf.mxu0 }
  0xff   :  { %v131_v13 = vadd.f32 %v153_v11, %v130_v12 }
 0x100   :  { %v170_v14 = vpop.f32.mrf.mxu0 }
 0x101   :  { %135 = vst.msk [vmem:[#allocation7] sm:$0x3] %vm134_vm2, %v131_v13 }
 0x102   :  { %233 = shalt.err (!%p230_p0)
}
 0x103   :  { %145 = dma.vmem_to_hbm [thread:$0]  %s143_s25, 32, %s290_s3, [#allocation4]  }
 0x104   :  { %246 = dma.done.wait [#allocation4], 32  }
 0x105   :  { %247 = vsyncadd [#allocation4], 4294967264 }
 0x106   :  { %149 = vsyncpa [#allocation3], 1 }
 0x107   :  { %150 = vsyncpa [#allocation6], 1 }
 0x108   :  { %151 = vsyncpa [#allocation4], 1 }

</bundles_post_ra>
